<compile_context>
chip_gen: v5e
topology: v5e:2x2
jax: 0.10.0
libtpu: 0.0.40
codegen_flags: <defaults>
</compile_context>

<pallas_src>
import functools
import math

import jax
import jax.numpy as jnp
from jax.experimental import pallas as pl
from jax.experimental.pallas import tpu as pltpu

_EPSILON = 1e-08


def _round_up(x, m):
    return ((x + m - 1) // m) * m


def _aufl_kernel(p_ref, lab_ref, out_ref, acc_ref, *,
                 num_classes, pack, common_class_index, delta, gamma,
                 eps, smooth, coef_fl, coef_ftl, hw_row, tile, t_inner, n_split):
    s = pl.program_id(1)
    t = pl.program_id(2)

    @pl.when(t == 0)
    def _init():
        acc_ref[...] = jnp.zeros_like(acc_ref)

    rows = num_classes * pack
    shift = pack.bit_length() - 1

    p = p_ref[...].astype(jnp.float32)                        # (rows, tile)

    # Row r holds class (r >> shift) for spatial half (r & (pack - 1)).
    row_iota = jax.lax.broadcasted_iota(jnp.int32, (rows, tile), 0)
    cls = (row_iota >> shift) if pack > 1 else row_iota
    is_back = cls == common_class_index

    # Expand (pack, tile) labels to (rows, tile) via sublane broadcasts + selects.
    lab8 = jnp.broadcast_to(lab_ref[0:1, :], (rows, tile))
    if pack > 1:
        half = row_iota & (pack - 1)
        for h in range(1, pack):
            lab_h = jnp.broadcast_to(lab_ref[h:h + 1, :], (rows, tile))
            lab8 = jnp.where(half == h, lab_h, lab8)
    gb = lab8 == cls                                          # one-hot mask (bool)

    # ---- Asymmetric Focal (CE) term, pre-scaled by (1 - weight) -------------
    log_p = jnp.log(p + eps)
    back_pow = jnp.exp(gamma * jnp.log(1.0 - p + eps))        # (1 - p + eps)^gamma
    fl_scale = jnp.where(is_back,
                         (-(coef_fl * (1.0 - delta))) * back_pow,
                         jnp.float32(-(coef_fl * delta)))
    fl = jnp.where(gb, log_p * fl_scale, 0.0)

    # ---- Asymmetric Focal Tversky term (reduction='none'), scaled by weight/C
    # One-hot algebra:  tp = g?p:0 ; den = g ? p(1-d)+d : d*p  (+ smooth).
    num = jnp.where(gb, p, 0.0) + smooth
    den = jnp.where(gb, p * (1.0 - delta) + delta, delta * p) + smooth
    if hasattr(pl, "reciprocal"):
        r = pl.reciprocal(den, approx=True)
        r = r * (2.0 - den * r)                               # one Newton step
        tv = num * r
    else:
        tv = num / den
    one_m_tv = 1.0 - tv
    focal = jnp.exp((-gamma) * jnp.log(one_m_tv + eps))       # (1-tv+eps)^(-gamma)
    w_ftl = jnp.where(is_back, jnp.float32(coef_ftl), coef_ftl * focal)
    contrib = fl + one_m_tv * w_ftl

    rem = hw_row % tile
    if rem != 0:
        # Only the last global spatial tile is ragged; gate the mask on it.
        is_edge = jnp.logical_and(s == n_split - 1, t == t_inner - 1)

        @pl.when(is_edge)
        def _edge():
            lane = jax.lax.broadcasted_iota(jnp.int32, (rows, tile), 1)
            acc_ref[...] += jnp.where(lane < rem, contrib, 0.0)

        @pl.when(jnp.logical_not(is_edge))
        def _body():
            acc_ref[...] += contrib
    else:
        acc_ref[...] += contrib

    @pl.when(t == t_inner - 1)
    def _finalize():
        out_ref[...] = jnp.broadcast_to(jnp.sum(acc_ref[...]), out_ref.shape)


def asymmetric_unified_focal_loss(y_pred, y_true, *, weight=0.5, delta=0.7,
                                  gamma=0.75, smooth=_EPSILON,
                                  common_class_index=0, ignore_index=None,
                                  tile_hw=65536):
    """y_pred: (B, C, *spatial) probabilities (f32 or bf16); y_true: (B, *spatial) ints."""
    if ignore_index is not None:
        # TODO(synk): ignore_index masking (data-dependent filtering) is not implemented.
        raise NotImplementedError("ignore_index is not supported in the Pallas kernel")

    b, c = int(y_pred.shape[0]), int(y_pred.shape[1])
    hw = int(math.prod(y_pred.shape[2:]))

    # Sublane packing: put pack spatial halves of every class in sublanes so the
    # 8-sublane vregs are fully used (pack is a power of two that divides hw).
    pack = max(1, 8 // c) if c <= 8 else 1
    while pack > 1 and hw % pack != 0:
        pack //= 2
    rows = c * pack
    hw_row = hw // pack

    p3 = y_pred.reshape(b, rows, hw_row)            # free, contiguous reshape
    lab = y_true if y_true.dtype == jnp.int32 else y_true.astype(jnp.int32)
    lab3 = lab.reshape(b, pack, hw_row)

    tile = max(128, min(_round_up(int(tile_hw), 128), _round_up(hw_row, 128)))
    grid_t = pl.cdiv(hw_row, tile)
    # v7x: give both TensorCores work when B == 1 by splitting the tile axis.
    n_split = 2 if (b == 1 and grid_t >= 2 and grid_t % 2 == 0) else 1
    t_inner = grid_t // n_split

    w_ftl = weight if weight is not None else 1.0
    coef_fl = (1.0 - weight) if weight is not None else 1.0
    coef_ftl = w_ftl / float(c)

    kernel = functools.partial(
        _aufl_kernel,
        num_classes=c, pack=pack, common_class_index=int(common_class_index),
        delta=float(delta), gamma=float(gamma), eps=float(_EPSILON),
        smooth=float(smooth), coef_fl=float(coef_fl), coef_ftl=float(coef_ftl),
        hw_row=hw_row, tile=tile, t_inner=t_inner, n_split=n_split)

    parts = pl.pallas_call(
        kernel,
        out_shape=jax.ShapeDtypeStruct((b * n_split, 1, 128), jnp.float32),
        grid_spec=pltpu.PrefetchScalarGridSpec(
            num_scalar_prefetch=0,
            grid=(b, n_split, t_inner),
            in_specs=[
                pl.BlockSpec((None, rows, tile),
                             lambda i, s, t: (i, 0, s * t_inner + t)),
                pl.BlockSpec((None, pack, tile),
                             lambda i, s, t: (i, 0, s * t_inner + t)),
            ],
            out_specs=pl.BlockSpec((None, 1, 128),
                                   lambda i, s, t: (i * n_split + s, 0, 0)),
            scratch_shapes=[pltpu.VMEM((rows, tile), jnp.float32)],
        ),
        compiler_params=pltpu.CompilerParams(
            dimension_semantics=("parallel", "parallel", "arbitrary"),
            vmem_limit_bytes=48 * 1024 * 1024),
    )(p3, lab3)

    # weight / (1-weight) / 1/C are already folded per element; normalize by #pixels.
    return jnp.sum(parts[:, 0, 0]) / jnp.float32(b * hw)


def _reference_loss(y_pred, y_true, *, weight=0.5, delta=0.7, gamma=0.75,
                    common_class_index=0):
    """Pure-JAX reference mirroring the PyTorch module semantics."""
    b, c = y_pred.shape[0], y_pred.shape[1]
    p = jnp.moveaxis(y_pred, 1, -1).reshape(-1, c).astype(jnp.float32)
    g = jax.nn.one_hot(y_true.reshape(-1), c, dtype=jnp.float32)
    is_back = jnp.arange(c)[None, :] == common_class_index

    ce = -g * jnp.log(p + _EPSILON)
    fl_elem = jnp.where(is_back,
                        (1.0 - delta) * jnp.power(1.0 - p + _EPSILON, gamma) * ce,
                        delta * ce)
    fl = jnp.mean(jnp.sum(fl_elem, axis=1))

    tp, fn, fp = p * g, (1.0 - p) * g, p * (1.0 - g)
    tv = (tp + _EPSILON) / (tp + delta * fn + delta * fp + _EPSILON)
    ftl_elem = jnp.where(is_back,
                         1.0 - tv,
                         (1.0 - tv) * jnp.power(1.0 - tv + _EPSILON, -gamma))
    ftl = jnp.mean(ftl_elem)
    if weight is None:
        return ftl + fl
    return weight * ftl + (1.0 - weight) * fl


if __name__ == "__main__":
    key = jax.random.PRNGKey(0)
    k_logits, k_labels = jax.random.split(key)

    B, C, H, W = 2, 4, 16, 16
    logits = jax.random.normal(k_logits, (B, C, H, W), dtype=jnp.float32)
    y_pred = jax.nn.softmax(logits, axis=1)                 # probabilities, NCHW
    y_true = jax.random.randint(k_labels, (B, H, W), 0, C, dtype=jnp.int32)

    loss = asymmetric_unified_focal_loss(y_pred, y_true)
    loss = jax.block_until_ready(loss)

    ref = jax.block_until_ready(_reference_loss(y_pred, y_true))
    assert jnp.allclose(loss, ref, rtol=1e-4, atol=1e-6), (loss, ref)

    print("KERNEL_OK")
</pallas_src>

<mosaic_0001>
module attributes {stable_mosaic.version = 11 : i64} {
  func.func @_aufl_kernel(%arg0: i32, %arg1: i32, %arg2: i32, %arg3: memref<1x8x128xf32, #tpu.memory_space<vmem>>, %arg4: memref<1x2x128xi32, #tpu.memory_space<vmem>>, %arg5: memref<1x1x128xf32, #tpu.memory_space<vmem>>, %arg6: memref<8x128xf32, #tpu.memory_space<vmem>>) attributes {dimension_semantics = [#tpu.dimension_semantics<parallel>, #tpu.dimension_semantics<parallel>, #tpu.dimension_semantics<arbitrary>], iteration_bounds = array<i64: 2, 1, 1>, scalar_prefetch = 0 : i64, scratch_operands = 1 : i64, tpu.core_type = #tpu.core_type<tc>, window_params = [{transform_indices = @transform_0, window_bounds = array<i64: 1, 8, 128>}, {transform_indices = @transform_1, window_bounds = array<i64: 1, 2, 128>}, {transform_indices = @transform_2, window_bounds = array<i64: 1, 1, 128>}]} {
    %c0_i32 = arith.constant 0 : i32
    %0 = arith.cmpi eq, %arg2, %c0_i32 : i32
    %1 = arith.extui %0 : i1 to i32
    %c0_i32_0 = arith.constant 0 : i32
    %2 = arith.cmpi ne, %1, %c0_i32_0 : i32
    scf.if %2 {
      %cst_35 = arith.constant 0.000000e+00 : f32
      %81 = vector.broadcast %cst_35 : f32 to vector<8x128xf32>
      %c0_36 = arith.constant 0 : index
      %c0_37 = arith.constant 0 : index
      %82 = vector.load %arg6[%c0_36, %c0_37] : memref<8x128xf32, #tpu.memory_space<vmem>>, vector<8x128xf32>
      tpu.vector_store %arg6[%c0_36, %c0_37], %81 {strides = array<i32>} : memref<8x128xf32, #tpu.memory_space<vmem>>, vector<8x128xf32>,
    } else {
    }
    %c0 = arith.constant 0 : index
    %c0_1 = arith.constant 0 : index
    %c0_2 = arith.constant 0 : index
    %3 = vector.load %arg3[%c0, %c0_1, %c0_2] : memref<1x8x128xf32, #tpu.memory_space<vmem>>, vector<1x8x128xf32>
    %4 = vector.shape_cast %3 : vector<1x8x128xf32> to vector<8x128xf32>
    %5 = tpu.iota {dimensions = array<i32: 0>} : vector<8x128xi32>
    %c1_i32 = arith.constant 1 : i32
    %6 = vector.broadcast %c1_i32 : i32 to vector<8x128xi32>
    %7 = arith.shrsi %5, %6 : vector<8x128xi32>
    %c0_i32_3 = arith.constant 0 : i32
    %8 = vector.broadcast %c0_i32_3 : i32 to vector<8x128xi32>
    %9 = arith.cmpi eq, %7, %8 : vector<8x128xi32>
    %c0_4 = arith.constant 0 : index
    %c0_5 = arith.constant 0 : index
    %c0_6 = arith.constant 0 : index
    %10 = vector.load %arg4[%c0_4, %c0_5, %c0_6] : memref<1x2x128xi32, #tpu.memory_space<vmem>>, vector<1x1x128xi32>
    %11 = vector.shape_cast %10 : vector<1x1x128xi32> to vector<1x128xi32>
    %12 = vector.shape_cast %11 : vector<1x128xi32> to vector<1x128xi32>
    %13 = vector.broadcast %12 : vector<1x128xi32> to vector<8x128xi32>
    %c1_i32_7 = arith.constant 1 : i32
    %14 = vector.broadcast %c1_i32_7 : i32 to vector<8x128xi32>
    %15 = arith.andi %5, %14 : vector<8x128xi32>
    %c0_8 = arith.constant 0 : index
    %c1 = arith.constant 1 : index
    %c0_9 = arith.constant 0 : index
    %16 = vector.load %arg4[%c0_8, %c1, %c0_9] : memref<1x2x128xi32, #tpu.memory_space<vmem>>, vector<1x1x128xi32>
    %17 = vector.shape_cast %16 : vector<1x1x128xi32> to vector<1x128xi32>
    %18 = vector.shape_cast %17 : vector<1x128xi32> to vector<1x128xi32>
    %19 = vector.broadcast %18 : vector<1x128xi32> to vector<8x128xi32>
    %c1_i32_10 = arith.constant 1 : i32
    %20 = vector.broadcast %c1_i32_10 : i32 to vector<8x128xi32>
    %21 = arith.cmpi eq, %15, %20 : vector<8x128xi32>
    %22 = arith.select %21, %19, %13 : vector<8x128xi1>, vector<8x128xi32>
    %23 = arith.cmpi eq, %22, %7 : vector<8x128xi32>
    %cst = arith.constant 9.99999993E-9 : f32
    %24 = vector.broadcast %cst : f32 to vector<8x128xf32>
    %25 = arith.addf %4, %24 : vector<8x128xf32>
    %26 = math.log %25 : vector<8x128xf32>
    %cst_11 = arith.constant 1.000000e+00 : f32
    %27 = vector.broadcast %cst_11 : f32 to vector<8x128xf32>
    %28 = arith.subf %27, %4 : vector<8x128xf32>
    %cst_12 = arith.constant 9.99999993E-9 : f32
    %29 = vector.broadcast %cst_12 : f32 to vector<8x128xf32>
    %30 = arith.addf %28, %29 : vector<8x128xf32>
    %31 = math.log %30 : vector<8x128xf32>
    %cst_13 = arith.constant 7.500000e-01 : f32
    %32 = vector.broadcast %cst_13 : f32 to vector<8x128xf32>
    %33 = arith.mulf %32, %31 : vector<8x128xf32>
    %34 = math.exp %33 : vector<8x128xf32>
    %cst_14 = arith.constant -1.500000e-01 : f32
    %35 = vector.broadcast %cst_14 : f32 to vector<8x128xf32>
    %36 = arith.mulf %35, %34 : vector<8x128xf32>
    %cst_15 = arith.constant -3.500000e-01 : f32
    %37 = vector.broadcast %cst_15 : f32 to vector<8x128xf32>
    %38 = arith.select %9, %36, %37 : vector<8x128xi1>, vector<8x128xf32>
    %39 = arith.mulf %26, %38 : vector<8x128xf32>
    %cst_16 = arith.constant 0.000000e+00 : f32
    %40 = vector.broadcast %cst_16 : f32 to vector<8x128xf32>
    %41 = arith.select %23, %39, %40 : vector<8x128xi1>, vector<8x128xf32>
    %cst_17 = arith.constant 0.000000e+00 : f32
    %42 = vector.broadcast %cst_17 : f32 to vector<8x128xf32>
    %43 = arith.select %23, %4, %42 : vector<8x128xi1>, vector<8x128xf32>
    %cst_18 = arith.constant 9.99999993E-9 : f32
    %44 = vector.broadcast %cst_18 : f32 to vector<8x128xf32>
    %45 = arith.addf %43, %44 : vector<8x128xf32>
    %cst_19 = arith.constant 3.000000e-01 : f32
    %46 = vector.broadcast %cst_19 : f32 to vector<8x128xf32>
    %47 = arith.mulf %4, %46 : vector<8x128xf32>
    %cst_20 = arith.constant 0.699999988 : f32
    %48 = vector.broadcast %cst_20 : f32 to vector<8x128xf32>
    %49 = arith.addf %47, %48 : vector<8x128xf32>
    %cst_21 = arith.constant 0.699999988 : f32
    %50 = vector.broadcast %cst_21 : f32 to vector<8x128xf32>
    %51 = arith.mulf %50, %4 : vector<8x128xf32>
    %52 = arith.select %23, %49, %51 : vector<8x128xi1>, vector<8x128xf32>
    %cst_22 = arith.constant 9.99999993E-9 : f32
    %53 = vector.broadcast %cst_22 : f32 to vector<8x128xf32>
    %54 = arith.addf %52, %53 : vector<8x128xf32>
    %55 = tpu.reciprocal %54 {approx = true} : vector<8x128xf32> -> vector<8x128xf32>
    %56 = arith.mulf %54, %55 : vector<8x128xf32>
    %cst_23 = arith.constant 2.000000e+00 : f32
    %57 = vector.broadcast %cst_23 : f32 to vector<8x128xf32>
    %58 = arith.subf %57, %56 : vector<8x128xf32>
    %59 = arith.mulf %55, %58 : vector<8x128xf32>
    %60 = arith.mulf %45, %59 : vector<8x128xf32>
    %cst_24 = arith.constant 1.000000e+00 : f32
    %61 = vector.broadcast %cst_24 : f32 to vector<8x128xf32>
    %62 = arith.subf %61, %60 : vector<8x128xf32>
    %cst_25 = arith.constant 9.99999993E-9 : f32
    %63 = vector.broadcast %cst_25 : f32 to vector<8x128xf32>
    %64 = arith.addf %62, %63 : vector<8x128xf32>
    %65 = math.log %64 : vector<8x128xf32>
    %cst_26 = arith.constant -7.500000e-01 : f32
    %66 = vector.broadcast %cst_26 : f32 to vector<8x128xf32>
    %67 = arith.mulf %66, %65 : vector<8x128xf32>
    %68 = math.exp %67 : vector<8x128xf32>
    %cst_27 = arith.constant 1.250000e-01 : f32
    %69 = vector.broadcast %cst_27 : f32 to vector<8x128xf32>
    %70 = arith.mulf %69, %68 : vector<8x128xf32>
    %cst_28 = arith.constant 1.250000e-01 : f32
    %71 = vector.broadcast %cst_28 : f32 to vector<8x128xf32>
    %72 = arith.select %9, %71, %70 : vector<8x128xi1>, vector<8x128xf32>
    %73 = arith.mulf %62, %72 : vector<8x128xf32>
    %74 = arith.addf %41, %73 : vector<8x128xf32>
    %c0_29 = arith.constant 0 : index
    %c0_30 = arith.constant 0 : index
    %75 = vector.load %arg6[%c0_29, %c0_30] : memref<8x128xf32, #tpu.memory_space<vmem>>, vector<8x128xf32>
    %76 = arith.addf %75, %74 : vector<8x128xf32>
    %c0_31 = arith.constant 0 : index
    %c0_32 = arith.constant 0 : index
    %77 = vector.load %arg6[%c0_31, %c0_32] : memref<8x128xf32, #tpu.memory_space<vmem>>, vector<8x128xf32>
    tpu.vector_store %arg6[%c0_31, %c0_32], %76 {strides = array<i32>} : memref<8x128xf32, #tpu.memory_space<vmem>>, vector<8x128xf32>,
    %c0_i32_33 = arith.constant 0 : i32
    %78 = arith.cmpi eq, %arg2, %c0_i32_33 : i32
    %79 = arith.extui %78 : i1 to i32
    %c0_i32_34 = arith.constant 0 : i32
    %80 = arith.cmpi ne, %79, %c0_i32_34 : i32
    scf.if %80 {
      %c0_35 = arith.constant 0 : index
      %c0_36 = arith.constant 0 : index
      %81 = vector.load %arg6[%c0_35, %c0_36] : memref<8x128xf32, #tpu.memory_space<vmem>>, vector<8x128xf32>
      %82 = vector.shape_cast %81 : vector<8x128xf32> to vector<1x8x128xf32>
      %cst_37 = arith.constant dense<0.000000e+00> : vector<1xf32>
      %83 = vector.multi_reduction <add>, %82, %cst_37 [1, 2] : vector<1x8x128xf32> to vector<1xf32>
      %84 = vector.shape_cast %83 : vector<1xf32> to vector<1x1x1xf32>
      %85 = vector.extract %84[0, 0, 0] : f32 from vector<1x1x1xf32>
      %86 = vector.broadcast %85 : f32 to vector<1x128xf32>
      %c0_38 = arith.constant 0 : index
      %c0_39 = arith.constant 0 : index
      %c0_40 = arith.constant 0 : index
      %87 = vector.load %arg5[%c0_38, %c0_39, %c0_40] : memref<1x1x128xf32, #tpu.memory_space<vmem>>, vector<1x1x128xf32>
      %88 = vector.shape_cast %87 : vector<1x1x128xf32> to vector<1x128xf32>
      %89 = vector.shape_cast %86 : vector<1x128xf32> to vector<1x1x128xf32>
      tpu.vector_store %arg5[%c0_38, %c0_39, %c0_40], %89 {strides = array<i32>} : memref<1x1x128xf32, #tpu.memory_space<vmem>>, vector<1x1x128xf32>,
    } else {
    }
    return
  }
  func.func @transform_0(%arg0: i32, %arg1: i32, %arg2: i32) -> (i32, i32, i32) {
    %c1_i32 = arith.constant 1 : i32
    %0 = arith.muli %arg1, %c1_i32 : i32
    %1 = arith.addi %0, %arg2 : i32
    %c0_i32 = arith.constant 0 : i32
    %c0_i32_0 = arith.constant 0 : i32
    return %arg0, %c0_i32, %1 : i32, i32, i32
  }
  func.func @transform_1(%arg0: i32, %arg1: i32, %arg2: i32) -> (i32, i32, i32) {
    %c1_i32 = arith.constant 1 : i32
    %0 = arith.muli %arg1, %c1_i32 : i32
    %1 = arith.addi %0, %arg2 : i32
    %c0_i32 = arith.constant 0 : i32
    %c0_i32_0 = arith.constant 0 : i32
    return %arg0, %c0_i32, %1 : i32, i32, i32
  }
  func.func @transform_2(%arg0: i32, %arg1: i32, %arg2: i32) -> (i32, i32, i32) {
    %c1_i32 = arith.constant 1 : i32
    %0 = arith.muli %arg0, %c1_i32 : i32
    %1 = arith.addi %0, %arg1 : i32
    %c0_i32 = arith.constant 0 : i32
    %c0_i32_0 = arith.constant 0 : i32
    %c0_i32_1 = arith.constant 0 : i32
    return %1, %c0_i32, %c0_i32_0 : i32, i32, i32
  }
}

</mosaic_0001>

<bundles_post_ra>
// kernel: tpu_custom_call.1
= control target key start
LH: loop header
LB: loop body
LE: loop exit
PB: predicated region body
PF: predicated region fallthrough
CT: control target
= control target key end

     0   :  { %7 = vsyncpa [#allocation4], 0  ;;  %s835_s0 = inlined_call_operand.hbm [shape: f32[2,8,128], index: 0, kind: input, shape index: {}]   ;;  %s836_s1 = inlined_call_operand.hbm [shape: s32[2,2,128], index: 1, kind: input, shape index: {}]   ;;  %s837_s2 = inlined_call_operand.hbm [shape: f32[2,1,128], index: 2, kind: output, shape index: {}]  }
   0x1   :  { %9 = vsyncpa [#allocation4 + $0x1], 0 }
   0x2   :  { %10 = vsyncpa [#allocation7], 0 }
   0x3   :  { %12 = vsyncpa [#allocation7 + $0x1], 0 }
   0x4   :  { %13 = vsyncpa [#allocation5], 0 }
   0x5   :  { %15 = vsyncpa [#allocation5 + $0x1], 0  ;;  %s686_s9 = smov 0   ;;  %s688_s10 = smov 0  }
   0x6   :  { %s690_s11 = smov 0   ;;  %s692_s12 = smov 0  }
   0x7   :  { %s694_s13 = smov 0   ;;  %s696_s14 = smov 0  }
   0x8 LB: > { %s427_s15 = sadd.s32 4294967295, %s669_s14   ;;  %s428_s16 = sadd.s32 4294967294, %s669_s14   ;;  %s669_s14 = sphi %s696_s14, %s21_s14   ;;  %s665_s13 = sphi %s694_s13, %s849_s13   ;;  %s661_s12 = sphi %s692_s12, %s848_s12   ;;  %s657_s11 = sphi %s690_s11, %s847_s11   ;;  %s653_s10 = sphi %s688_s10, %s846_s10   ;;  %s649_s9 = sphi %s686_s9, %s845_s9  }
   0x9   : > { %s40_s17 = sadd.s32 1, %s665_s13  ;;  %s51_s18 = sadd.s32 1, %s657_s11 }
   0xa   : > { %p42_p0 = scmp.ge.s32.totalorder %s40_s17, 2  ;;  %p58_p1 = scmp.ne.s32.totalorder %s657_s11, %s653_s10 }
   0xb   : > { %p59_p2 = scmp.eq.s32.totalorder %s669_s14, 0  ;;  %p64_p3 = scmp.ne.s32.totalorder %s653_s10, %s649_s9 }
   0xc   : > { %s851_s17 = smov (%p42_p0, %s40_s17), 0  ;;  %p65_p5 = scmp.eq.s32.totalorder %s427_s15, 0 }
   0xd   : > { %p727_p4 = por %p59_p2, %p58_p1  ;;  %s46_s20 = ssub.s32 %s665_s13, %s851_s17 }
   0xe   : > { %p120_p6 = scmp.eq.s32.totalorder %s427_s15, 1  ;;  %p49_p7 = scmp.eq.s32.totalorder %s46_s20, 0 }
   0xf   : > { %p733_p8 = por %p65_p5, %p64_p3  ;;  %p126_p10 = scmp.eq.s32.totalorder %s428_s16, 1 }
  0x10   : > { %p737_p9 = por %p120_p6, %p58_p1  ;;  %p430_p12 = scmp.ge.s32.totalorder %s669_s14, 2 }
  0x11   : > { %s742_s23 = scalar_select %p49_p7, %s657_s11, %s51_s18  }
  0x12   : > { %p744_p11 = por %p126_p10, %p64_p3  ;;  %p459_p13 = scmp.lt.s32.totalorder %s669_s14, 2 }
  0x13   : > { %s146_s25 = sand.u32 1, %s657_s11   ;;  %s432_s27 = sshll.u32 %s665_s13, 3 }
  0x14   : > { %s431_s26 = sshll.u32 %s146_s25, 3  ;;  %s156_s30 = scalar_lea.hbm %s835_s0, %s432_s27 }
  0x15   : > { %s150_s3 = scalar_lea.vmem [#allocation3], %s431_s26  ;;  %s158_s5 = sshll.u32 %s156_s30, 4  ;;  %s159_s5 = int_to_ptr.hbm [resolvable:$true] %s158_s5 }
  0x16   : > { %s160_s4 = sshll.u32 %s150_s3, 4  ;;  %p757_p0 = pnand %p459_p13, %p727_p4  ;;  %s161_s4 = int_to_ptr.vmem [resolvable:$true] %s160_s4 }
  0x17   : > { %p435_p1 = scmp.ge.s32.totalorder %s669_s14, 1  ;;  %p186_p2 = scmp.lt.s32.totalorder %s669_s14, 3 }
  0x18   : > { %s147_s7 = scalar_lea.sflag [#allocation4], %s146_s25  ;;  %s433_s8 = sshll.u32 %s146_s25, 1 }
  0x19   : > { %451 = dma.hbm_to_vmem [thread:$0]  (!%p757_p0), %s159_s5, 128, %s161_s4, %s147_s7  }
  0x1a   : > { %p187_p3 = pnand %p435_p1, %p186_p2  ;;  %s434_s15 = sshll.u32 %s665_s13, 1 }
  0x1b   : > { %s177_s20 = scalar_lea.hbm %s836_s1, %s434_s15  ;;  %s171_s26 = scalar_lea.vmem [#allocation6], %s433_s8 }
  0x1c   : > { %s181_s19 = sshll.u32 %s171_s26, 4  ;;  %s179_s27 = sshll.u32 %s177_s20, 4  ;;  %s182_s19 = int_to_ptr.vmem [resolvable:$true] %s181_s19  ;;  %s180_s27 = int_to_ptr.hbm [resolvable:$true] %s179_s27 }
  0x1d   : > { %s168_s28 = scalar_lea.sflag [#allocation7], %s146_s25  ;;  %190 = sbr.rel (%p187_p3) target bundleno = 278 (0x116), region = 28 }
  0x1e   : > { %454 = dma.hbm_to_vmem [thread:$0]  (!%p757_p0), %s180_s27, 32, %s182_s19, %s168_s28  }
  0x1f   : > { %s772_s29 = sand.u32 (!%p187_p3), 1, %s653_s10  }
  0x20   : > { %s436_s30 = sshll.u32 (!%p187_p3), %s772_s29, 3  ;;  %s193_s3 = scalar_lea.sflag (!%p187_p3), [#allocation4], %s772_s29 }
  0x21   : > { %s196_s4 = scalar_lea.vmem (!%p187_p3), [#allocation3], %s436_s30 }
  0x22   : > { %636 = dma.done.wait (%p733_p8), %s193_s3, 128  }
  0x23   : > { %638 = vsyncadd (%p733_p8), %s193_s3, 4294967168  ;;  %s437_s25 = sshll.u32 %s772_s29, 1  ;;  %s203_s5 = scalar_lea.sflag [#allocation7], %s772_s29 }
  0x24   : > { %s206_s6 = scalar_lea.vmem [#allocation6], %s437_s25 }
  0x25   : > { %640 = dma.done.wait (%p733_p8), %s203_s5, 32  }
  0x26   : > { %642 = vsyncadd (%p733_p8), %s203_s5, 4294967264  ;;  %v241_v0 = vlaneseq  ;;  %v240_v4 = vld [vmem:[%s196_s4] sm:$0xff]  ;;  %v509_v5 = vld [vmem:[%s206_s6] ss:$0 sm:$0xff]  ;;  %s318_s8 = scalar_lea.hbm %s837_s2, %s661_s12  ;;  %s231_s15 = scalar_lea.vmem [#allocation8], %s772_s29 }
  0x27   : > { %v510_v6 = vld [vmem:[%s206_s6 + $0x1] ss:$0 sm:$0xff]  ;;  %v256_v7 = vsub.f32 1.0, %v240_v4  ;;  %v269_v8 = vmul.f32 0.3, %v240_v4  ;;  %s320_s16 = sshll.u32 %s231_s15, 4  ;;  %s321_s16 = int_to_ptr.vmem [resolvable:$true] %s320_s16 }
  0x28   : > { %v242_v1 = vshrl.u32 %v241_v0, 7  ;;  %v271_v9 = vmul.f32 0.7, %v240_v4  ;;  %v253_v29 = vadd.f32 1e-08, %v240_v4  ;;  %s322_s18 = sshll.u32 %s318_s8, 4  ;;  %s323_s18 = int_to_ptr.hbm [resolvable:$true] %s322_s18 }
  0x29   : > { %v257_v12 = vadd.f32 1e-08, %v256_v7  ;;  %v270_v13 = vadd.f32 0.7, %v269_v8  ;;  %s309_s26 = scalar_lea.sflag [#allocation5], %s772_s29  ;;  %s597_s19 = sshra.s32 %s323_s18, 4  ;;  %s598_s19 = int_to_ptr.hbm [resolvable:$true] %s597_s19 }
  0x2a   : > { %v247_v2 = vand.u32 1, %v242_v1  ;;  %v243_v3 = vshra.s32 %v242_v1, 1  ;;  %s599_s27 = scalar_lea.hbm %s598_s19, 1  ;;  %s603_s12 = scalar_lea.hbm %s837_s2, 2 }
  0x2b   : > { %511 = vlog2.f32 %v257_v12  ;;  %p600_p4 = scmp.ne.s32.totalorder %s598_s19, %s599_s27  ;;  %p604_p7 = scmp.lt.s32.totalorder %s598_s19, %s837_s2 }
  0x2c   : > { %vm250_vm0 = vcmp.eq.s32.totalorder %v247_v2, 1  ;;  %vm244_vm2 = vcmp.eq.s32.totalorder %v243_v3, 0  ;;  %p605_p8 = scmp.lt.s32.totalorder %s603_s12, %s599_s27 }
  0x2d   : > { %v251_v10 = vsel %vm250_vm0, %v510_v6, %v509_v5  ;;  %p601_p5 = pnand %p600_p4, %p737_p9 }
  0x2e   : > { %vm786_vm1 = vcmp.eq.s32.totalorder %v251_v10, %v243_v3  ;;  %p606_p10 = por %p605_p8, %p604_p7 }
  0x2f   : > { %v272_v14 = vsel %vm786_vm1, %v270_v13, %v271_v9  ;;  %v267_v18 = vsel %vm786_vm1, %v240_v4, 0.0  ;;  %p602_p6 = pneg %p601_p5 }
  0x30   : > { %v273_v15 = vadd.f32 1e-08, %v272_v14  ;;  %v268_v21 = vadd.f32 1e-08, %v267_v18 }
  0x31   : > { %v512_v16 = vpop.eup %511  ;;  %p607_p13 = pnand %p606_p10, %p602_p6 }
  0x32   : > { %513 = vrcp.f32 %v273_v15  ;;  %v259_v20 = vmul.f32 0.6931472, %v512_v16 }
  0x34   : > { %v260_v24 = vmul.f32 0.75, %v259_v20 }
  0x36   : > { %v261_v27 = vmul.f32 1.442695, %v260_v24 }
  0x38   : > { %v514_v17 = vpop.eup %513 }
  0x39   : > { %v275_v19 = vmul.f32 %v514_v17, %v273_v15 }
  0x3b   : > { %v276_v22 = vsub.f32 2.0, %v275_v19 }
  0x3d   : > { %v277_v23 = vmul.f32 %v514_v17, %v276_v22 }
  0x3f   : > { %v278_v25 = vmul.f32 %v277_v23, %v268_v21 }
  0x41   : > { %v279_v26 = vsub.f32 1.0, %v278_v25 }
  0x43   : > { %v280_v28 = vadd.f32 1e-08, %v279_v26 }
  0x45   : > { %515 = vlog2.f32 %v280_v28 }
  0x46   : > { %517 = vpow2.f32 %v261_v27 }
  0x47   : > { %519 = vlog2.f32 %v253_v29 }
  0x4b   : > { %v516_v30 = vpop.eup %515 }
  0x4c   : > { %v282_v31 = vmul.f32 0.6931472, %v516_v30  ;;  %v518_v32 = vpop.eup %517 }
  0x4d   : > { %v520_v34 = vpop.eup %519  ;;  %v263_v35 = vmul.f32 -0.15, %v518_v32 }
  0x4e   : > { %v283_v33 = vmul.f32 -0.75, %v282_v31  ;;  %v255_v37 = vmul.f32 0.6931472, %v520_v34 }
  0x4f   : > { %v264_v38 = vsel %vm244_vm2, %v263_v35, -0.35 }
  0x50   : > { %v284_v36 = vmul.f32 1.442695, %v283_v33  ;;  %v265_v39 = vmul.f32 %v264_v38, %v255_v37 }
  0x52   : > { %521 = vpow2.f32 %v284_v36  ;;  %v266_v42 = vsel %vm786_vm1, %v265_v39, 0.0 }
  0x58   : > { %v522_v40 = vpop.eup %521 }
  0x59   : > { %v286_v41 = vmul.f32 0.125, %v522_v40 }
  0x5b   : > { %v287_v43 = vsel %vm244_vm2, 0.125, %v286_v41 }
  0x5c   : > { %v288_v44 = vmul.f32 %v287_v43, %v279_v26 }
  0x5e   : > { %v289_v45 = vadd.f32 %v288_v44, %v266_v42 }
  0x60   : > { %297 = vadd.xlane.f32.xlu0 %v289_v45 }
  0xd3   : > { %v298_v46 = vpop.xlane.xlu0 %297 }
  0xd4   : > { %v299_v47 = vrot.slane %v298_v46, 4 }
  0xd6   : > { %v300_v48 = vadd.f32 %v299_v47, %v298_v46 }
  0xd8   : > { %v301_v49 = vrot.slane %v300_v48, 2 }
  0xda   : > { %v302_v50 = vadd.f32 %v301_v49, %v300_v48 }
  0xdc   : > { %v303_v51 = vrot.slane %v302_v50, 1 }
  0xde   : > { %v304_v52 = vadd.f32 %v303_v51, %v302_v50 }
  0xe0   : > { %440 = vpush %v304_v52 }
 0x111   : > { %s441_s20 = spop %440 }
 0x112   : > { %v306_v53 = vstv %s441_s20 }
 0x113   : > { %307 = vst [vmem:[%s231_s15] sm:$0x1] %v306_v53 }
 0x114   : > { %610 = shalt.err (!%p607_p13)
}
 0x115   : > { %446 = dma.vmem_to_hbm [thread:$0]  (%p737_p9), %s321_s16, 16, %s323_s18, %s309_s26  }
 0x116 PF: > { %s334_s29 = sand.u32 1, %s649_s9   ;;  %p456_p0 = pnand %p430_p12, %p744_p11 }
 0x117   : > { %s335_s25 = scalar_lea.sflag [#allocation5], %s334_s29 }
 0x118   : > { %p457_p1 = pneg %p456_p0 }
 0x11a   : > { %644 = dma.done.wait (%p457_p1), %s335_s25, 16  }
 0x11b   : > { %646 = vsyncadd (%p457_p1), %s335_s25, 4294967280  ;;  %s21_s14 = sadd.s32 1, %s669_s14   ;;  %s845_s9 = smov %s653_s10 }
 0x11c   : > { %p18_p2 = scmp.ge.s32.totalorder %s21_s14, 4   ;;  %s846_s10 = smov %s657_s11 }
 0x11d   : > { %s847_s11 = smov %s742_s23  ;;  %s848_s12 = smov %s665_s13 }
 0x11e   : > { %s849_s13 = smov %s851_s17  ;;  %20 = sbr.rel (!%p18_p2) target bundleno = 8 (0x8), region = 94 }
 0x123   :  { %340 = vsyncpa [#allocation4], 1 }
 0x124   :  { %342 = vsyncpa [#allocation4 + $0x1], 1 }
 0x125   :  { %343 = vsyncpa [#allocation7], 1 }
 0x126   :  { %345 = vsyncpa [#allocation7 + $0x1], 1 }
 0x127   :  { %346 = vsyncpa [#allocation5], 1 }
 0x128   :  { %348 = vsyncpa [#allocation5 + $0x1], 1 }

</bundles_post_ra>
